<compile_context>
chip_gen: v6e
topology: v6e:2x2x1
jax: 0.10.0
libtpu: 0.0.40
codegen_flags: <defaults>
</compile_context>

<pallas_src>
import numpy as np
import jax
import jax.numpy as jnp
from jax.experimental import pallas as pl
from jax.experimental.pallas import tpu as pltpu

H = 9      # max conv tap offset (kernel 3, dilation 9)
HS = 16    # halo slab rows (multiple of 8, >= H)
EPS = 1e-5


def _round_up(a, b):
    return (a + b - 1) // b * b


# ----------------------------------------------------------------------------
# Parameter init (deterministic, synthetic — matches the shapes of the module)
# ----------------------------------------------------------------------------
def init_params(key, cin, cout, stride):
    K = 2 * stride
    keys = iter(jax.random.split(key, 32))

    def nrm(shape, scale=0.3):
        return scale * jax.random.normal(next(keys), shape, jnp.float32)

    p = {}
    p["wt"] = nrm((cin, cout, K))          # ConvTranspose1d weight (Cin, Cout, K)
    p["bt"] = nrm((cout,), 0.1)
    p["bn0w"] = 1.0 + nrm((cout,), 0.1)
    p["bn0b"] = nrm((cout,), 0.1)
    for i in (1, 2, 3):
        p[f"w{i}1"] = nrm((cout, cout, 3))  # Conv1d k=3 weight (Cout, Cin, 3)
        p[f"b{i}1"] = nrm((cout,), 0.1)
        p[f"bn{i}1w"] = 1.0 + nrm((cout,), 0.1)
        p[f"bn{i}1b"] = nrm((cout,), 0.1)
        p[f"w{i}2"] = nrm((cout, cout, 1))  # Conv1d k=1 weight (Cout, Cin, 1)
        p[f"b{i}2"] = nrm((cout,), 0.1)
        p[f"bn{i}2w"] = 1.0 + nrm((cout,), 0.1)
        p[f"bn{i}2b"] = nrm((cout,), 0.1)
    return p


# ----------------------------------------------------------------------------
# Pallas kernels + wrapper
# ----------------------------------------------------------------------------
def upsampling_layer_forward(x, gamma, beta, params, stride):
    """x: (B, Cin, L) f32; gamma, beta: (B, Cout, 1) f32.  Returns (B, Cout, T)."""
    f32 = jnp.float32
    B, cin, L = x.shape
    C = params["bt"].shape[0]
    S = stride
    out_pad = 6 if cin == 512 else (5 if cin == 256 else 0)

    M = B * (L + 1)                 # compact ConvT rows (one per input pos + 1)
    T0 = (L + 1) * S                # ConvT length before output_padding
    T = T0 + out_pad                # final time length
    Cp = _round_up(max(C, 128), 128)
    twoCin = 2 * cin
    SCp = S * Cp

    Tpad = T + 2 * H                # per-batch row block: [H pad | T | H pad]
    Nr = B * Tpad
    rn = min(256, _round_up(Nr, HS))          # residual-stack row tile
    Np = _round_up(Nr, rn)
    nb = Np // rn
    tm = min(256, _round_up(M, 8))            # ConvT row tile
    Mp = _round_up(M, tm)

    def cpad(a, axis):
        pw = [(0, 0)] * a.ndim
        pw[axis] = (0, Cp - a.shape[axis])
        return jnp.pad(a, pw)

    # ----------------------- wrapper-side glue (cheap XLA) -----------------------
    # compact two-tap input rows: xcat[b*(L+1)+j] = [X[b,j] (or 0), X[b,j-1] (or 0)]
    X = jnp.transpose(x, (0, 2, 1)).astype(f32)                 # (B, L, Cin)
    zrow = jnp.zeros((B, 1, cin), f32)
    xa = jnp.concatenate([X, zrow], axis=1)                     # tap j
    xb = jnp.concatenate([zrow, X], axis=1)                     # tap j-1
    xcat = jnp.concatenate([xa, xb], axis=2).reshape(M, twoCin)
    xcat = jnp.pad(xcat, ((0, Mp - M), (0, 0)))

    # fat ConvT weight: columns [r*Cp:(r+1)*Cp] = [wt[:,:,r]; wt[:,:,S+r]]
    wt_p = cpad(params["wt"].astype(f32), 1)                    # (Cin, Cp, K)
    w_lo = jnp.transpose(wt_p[:, :, :S], (2, 0, 1))             # (S, Cin, Cp)
    w_hi = jnp.transpose(wt_p[:, :, S:], (2, 0, 1))             # (S, Cin, Cp)
    wcat = jnp.concatenate([w_lo, w_hi], axis=1)                # (S, 2Cin, Cp)
    w_fat = jnp.transpose(wcat, (1, 0, 2)).reshape(twoCin, SCp)
    bt_p = cpad(params["bt"].astype(f32), 0)[None, :]           # (1, Cp)
    bias_fat = jnp.tile(bt_p, (1, S))                           # (1, S*Cp)

    # ------------------ Kernel A: ConvTranspose1d as one fat matmul ------------------
    def upsample_kernel(x_ref, w_ref, b_ref, o_ref):
        o_ref[...] = (jnp.dot(x_ref[...], w_ref[...],
                              preferred_element_type=jnp.float32) + b_ref[...])

    y_up = pl.pallas_call(
        upsample_kernel,
        out_shape=jax.ShapeDtypeStruct((Mp, SCp), f32),
        grid=(Mp // tm,),
        in_specs=[pl.BlockSpec((tm, twoCin), lambda i: (i, 0)),
                  pl.BlockSpec((twoCin, SCp), lambda i: (0, 0)),
                  pl.BlockSpec((1, SCp), lambda i: (0, 0))],
        out_specs=pl.BlockSpec((tm, SCp), lambda i: (i, 0)),
        compiler_params=pltpu.CompilerParams(
            dimension_semantics=("parallel",),
            vmem_limit_bytes=48 * 1024 * 1024),
    )(xcat, w_fat, bias_fat)

    # phase->time interleave is a free contiguous reshape of (M, S*Cp)
    up_bt = y_up[:M].reshape(B, T0, Cp)
    if out_pad:
        # output_padding positions receive only the ConvT bias (no taps reach them)
        pad_rows = jnp.broadcast_to(bt_p[None], (B, out_pad, Cp))
        up_bt = jnp.concatenate([up_bt, pad_rows], axis=1)      # (B, T, Cp)
    up_rows = jnp.pad(up_bt, ((0, 0), (H, H), (0, 0))).reshape(Nr, Cp)
    up_rows = jnp.pad(up_rows, ((0, Np - Nr), (0, 0)))          # (Np, Cp)

    # row-validity mask (excludes per-batch halo pads and tail padding)
    tloc = jnp.arange(Tpad)
    vrow = ((tloc >= H) & (tloc < H + T)).astype(f32)
    mask = jnp.broadcast_to(vrow[None, :], (B, Tpad)).reshape(Nr, 1)
    mask = jnp.pad(mask, ((0, Np - Nr), (0, 0)))                # (Np, 1)

    # FiLM gamma/beta, pre-broadcast to rows (streamed; no in-kernel batch selects)
    gam2 = cpad(gamma[:, :, 0].astype(f32), 1)                  # (B, Cp)
    bet2 = cpad(beta[:, :, 0].astype(f32), 1)
    gam_rows = jnp.pad(jnp.broadcast_to(gam2[:, None, :], (B, Tpad, Cp)).reshape(Nr, Cp),
                       ((0, Np - Nr), (0, 0)))
    bet_rows = jnp.pad(jnp.broadcast_to(bet2[:, None, :], (B, Tpad, Cp)).reshape(Nr, Cp),
                       ((0, Np - Nr), (0, 0)))

    # conv / BN parameters, channel-padded to Cp
    bn0w = cpad(params["bn0w"].astype(f32), 0)[None, :]
    bn0b = cpad(params["bn0b"].astype(f32), 0)[None, :]
    w3, b3, bn3, w1, b1, bn1 = {}, {}, {}, {}, {}, {}
    for i in (1, 2, 3):
        w3[i] = cpad(cpad(jnp.transpose(params[f"w{i}1"].astype(f32), (2, 1, 0)), 1), 2)
        b3[i] = cpad(params[f"b{i}1"].astype(f32), 0)[None, :]
        bn3[i] = (cpad(params[f"bn{i}1w"].astype(f32), 0)[None, :],
                  cpad(params[f"bn{i}1b"].astype(f32), 0)[None, :])
        w1[i] = cpad(cpad(params[f"w{i}2"][:, :, 0].T.astype(f32), 0), 1)
        b1[i] = cpad(params[f"b{i}2"].astype(f32), 0)[None, :]
        bn1[i] = (cpad(params[f"bn{i}2w"].astype(f32), 0)[None, :],
                  cpad(params[f"bn{i}2b"].astype(f32), 0)[None, :])

    # ------------------------- shared specs & small helpers -------------------------
    row_spec = pl.BlockSpec((rn, Cp), lambda i: (i, 0))
    mask_spec = pl.BlockSpec((rn, 1), lambda i: (i, 0))
    stats_spec = pl.BlockSpec((8, Cp), lambda i: (0, 0))

    def const_spec(shape):
        return pl.BlockSpec(shape, lambda *_: (0,) * len(shape))

    nblk = rn // HS
    last_hblk = Np // HS - 1
    prev_spec = pl.BlockSpec((HS, Cp), lambda i: (jnp.maximum(i * nblk - 1, 0), 0))
    next_spec = pl.BlockSpec((HS, Cp), lambda i: (jnp.minimum((i + 1) * nblk, last_hblk), 0))

    rows_shape = jax.ShapeDtypeStruct((Np, Cp), f32)
    stats_shape = jax.ShapeDtypeStruct((8, Cp), f32)
    params_arb = pltpu.CompilerParams(dimension_semantics=("arbitrary",),
                                      vmem_limit_bytes=48 * 1024 * 1024)
    params_par = pltpu.CompilerParams(dimension_semantics=("parallel",),
                                      vmem_limit_bytes=48 * 1024 * 1024)

    def accum_stats(y, msk, st_ref):
        # Welford chunk-combine over row tiles; st_ref rows: 0=mean 1=var 2=n 3=M2.
        @pl.when(pl.program_id(0) == 0)
        def _():
            st_ref[...] = jnp.zeros_like(st_ref)
        n_t = jnp.sum(msk, axis=0, keepdims=True)                 # (1, 1)
        s_t = jnp.sum(y * msk, axis=0, keepdims=True)             # (1, Cp)
        mu_t = s_t / jnp.maximum(n_t, 1.0)
        dc = (y - mu_t) * msk
        m2_t = jnp.sum(dc * dc, axis=0, keepdims=True)
        n = st_ref[2:3, :]
        mu = st_ref[0:1, :]
        m2 = st_ref[3:4, :]
        n_new = n + n_t
        frac = n_t / jnp.maximum(n_new, 1.0)
        delta = mu_t - mu
        st_ref[0:1, :] = mu + delta * frac
        st_ref[3:4, :] = m2 + m2_t + delta * delta * (n * frac)
        st_ref[2:3, :] = n_new

        @pl.when(pl.program_id(0) == pl.num_programs(0) - 1)
        def _():
            st_ref[1:2, :] = st_ref[3:4, :] / jnp.maximum(st_ref[2:3, :], 1.0)

    # --------------------------- per-stage Pallas passes ---------------------------
    def stats_pass(xrows):
        def kernel(x_ref, m_ref, st_ref):
            accum_stats(x_ref[...], m_ref[...], st_ref)
        return pl.pallas_call(
            kernel, out_shape=stats_shape, grid=(nb,),
            in_specs=[row_spec, mask_spec], out_specs=stats_spec,
            compiler_params=params_arb,
        )(xrows, mask)

    def conv3_pass(xrows, w, b, dil):
        # k=3 dilated "same" conv on the per-batch zero-padded row layout; halo slabs
        # give the +/-dil taps as static slices of an already-resident window.
        def kernel(xp_ref, xc_ref, xn_ref, w_ref, b_ref, m_ref, y_ref, st_ref):
            win = jnp.concatenate([xp_ref[...], xc_ref[...], xn_ref[...]], axis=0)
            acc = None
            for k in range(3):
                off = HS + (k - 1) * dil
                t = jnp.dot(win[off:off + rn, :], w_ref[k],
                            preferred_element_type=jnp.float32)
                acc = t if acc is None else acc + t
            acc = acc + b_ref[...]
            y_ref[...] = acc
            accum_stats(acc, m_ref[...], st_ref)

        return pl.pallas_call(
            kernel, out_shape=(rows_shape, stats_shape), grid=(nb,),
            in_specs=[prev_spec, row_spec, next_spec,
                      const_spec((3, Cp, Cp)), const_spec((1, Cp)), mask_spec],
            out_specs=(row_spec, stats_spec),
            compiler_params=params_arb,
        )(xrows, xrows, xrows, w, b, mask)

    def conv1_pass(xrows, w, b):
        def kernel(x_ref, w_ref, b_ref, m_ref, y_ref, st_ref):
            acc = jnp.dot(x_ref[...], w_ref[...],
                          preferred_element_type=jnp.float32) + b_ref[...]
            y_ref[...] = acc
            accum_stats(acc, m_ref[...], st_ref)

        return pl.pallas_call(
            kernel, out_shape=(rows_shape, stats_shape), grid=(nb,),
            in_specs=[row_spec, const_spec((Cp, Cp)), const_spec((1, Cp)), mask_spec],
            out_specs=(row_spec, stats_spec),
            compiler_params=params_arb,
        )(xrows, w, b, mask)

    def norm_pass(y, stats, bnw, bnb, *, film_in=False, film_out=False, skip=None):
        has_film = film_in or film_out
        add_skip = skip is not None

        def kernel(*refs):
            it = iter(refs)
            y_ref = next(it); st_ref = next(it); bw_ref = next(it); bb_ref = next(it)
            m_ref = next(it)
            if has_film:
                g_ref = next(it); be_ref = next(it)
            if add_skip:
                sk_ref = next(it)
            o_ref = next(it)
            mean = st_ref[0:1, :]
            var = st_ref[1:2, :]
            z = (y_ref[...] - mean) * jax.lax.rsqrt(var + EPS) * bw_ref[...] + bb_ref[...]
            a = jnp.where(z > 0, z, jnp.exp(jnp.minimum(z, 0.0)) - 1.0)   # ELU(alpha=1)
            if film_in:
                a = g_ref[...] * a + be_ref[...]
            a = a * m_ref[...]          # zero the per-batch pad rows (conv 'same' zeros)
            if add_skip:
                a = a + sk_ref[...]
            if film_out:
                a = g_ref[...] * a + be_ref[...]
            o_ref[...] = a

        in_specs = [row_spec, stats_spec, const_spec((1, Cp)), const_spec((1, Cp)),
                    mask_spec]
        args = [y, stats, bnw, bnb, mask]
        if has_film:
            in_specs += [row_spec, row_spec]
            args += [gam_rows, bet_rows]
        if add_skip:
            in_specs += [row_spec]
            args += [skip]

        return pl.pallas_call(
            kernel, out_shape=rows_shape, grid=(nb,),
            in_specs=in_specs, out_specs=row_spec,
            compiler_params=params_par,
        )(*args)

    # ------------------------------ residual pipeline ------------------------------
    stats0 = stats_pass(up_rows)
    o1 = norm_pass(up_rows, stats0, bn0w, bn0b, film_in=True)            # skip = o1
    y2, st2 = conv3_pass(o1, w3[1], b3[1], 1)
    o2 = norm_pass(y2, st2, *bn3[1])
    y3, st3 = conv1_pass(o2, w1[1], b1[1])
    skip1 = norm_pass(y3, st3, *bn1[1], skip=o1)                         # o1 + o3
    y4, st4 = conv3_pass(skip1, w3[2], b3[2], 3)
    o4 = norm_pass(y4, st4, *bn3[2])
    y5, st5 = conv1_pass(o4, w1[2], b1[2])
    skip2 = norm_pass(y5, st5, *bn1[2], skip=skip1)                      # o1 + o3 + o5
    y6, st6 = conv3_pass(skip2, w3[3], b3[3], 9)
    o6 = norm_pass(y6, st6, *bn3[3])
    y7, st7 = conv1_pass(o6, w1[3], b1[3])
    out_rows = norm_pass(y7, st7, *bn1[3], skip=skip2, film_out=True)    # gamma*o8+beta

    out = out_rows[:Nr].reshape(B, Tpad, Cp)[:, H:H + T, :C]
    return jnp.transpose(out, (0, 2, 1))                                 # back to NCL


# ----------------------------------------------------------------------------
# Pure-numpy reference implementing the PyTorch semantics (float64)
# ----------------------------------------------------------------------------
def np_convT(x, w, b, S, op=0):
    B, Cin, L = x.shape
    _, Cout, K = w.shape
    T = (L - 1) * S + K + op
    out = np.zeros((B, Cout, T))
    for i in range(L):
        for k in range(K):
            out[:, :, i * S + k] += x[:, :, i] @ w[:, :, k]
    return out + b[None, :, None]


def np_bn(x, w, b, eps=1e-5):
    m = x.mean(axis=(0, 2), keepdims=True)
    v = x.var(axis=(0, 2), keepdims=True)
    return (x - m) / np.sqrt(v + eps) * w[None, :, None] + b[None, :, None]


def np_elu(x):
    return np.where(x > 0, x, np.expm1(x))


def np_conv_same(x, w, b, d):
    B, Cin, L = x.shape
    Cout, _, K = w.shape
    pad = d * (K - 1) // 2
    xp = np.pad(x, ((0, 0), (0, 0), (pad, pad)))
    out = np.zeros((B, Cout, L))
    for k in range(K):
        seg = xp[:, :, k * d: k * d + L]
        out += np.einsum("bcl,oc->bol", seg, w[:, :, k])
    return out + b[None, :, None]


def ref_forward(x, gamma, beta, p, S):
    p = {k: np.asarray(v, np.float64) for k, v in p.items()}
    x = np.asarray(x, np.float64)
    gamma = np.asarray(gamma, np.float64)
    beta = np.asarray(beta, np.float64)
    cin = x.shape[1]
    op = 6 if cin == 512 else (5 if cin == 256 else 0)

    o1 = np_elu(np_bn(np_convT(x, p["wt"], p["bt"], S, op), p["bn0w"], p["bn0b"]))
    o1 = gamma * o1 + beta
    o2 = np_elu(np_bn(np_conv_same(o1, p["w11"], p["b11"], 1), p["bn11w"], p["bn11b"]))
    o3 = np_elu(np_bn(np_conv_same(o2, p["w12"], p["b12"], 1), p["bn12w"], p["bn12b"]))
    o4 = np_elu(np_bn(np_conv_same(o3 + o1, p["w21"], p["b21"], 3), p["bn21w"], p["bn21b"]))
    o5 = np_elu(np_bn(np_conv_same(o4, p["w22"], p["b22"], 1), p["bn22w"], p["bn22b"]))
    o6 = np_elu(np_bn(np_conv_same(o1 + o3 + o5, p["w31"], p["b31"], 9), p["bn31w"], p["bn31b"]))
    o7 = np_elu(np_bn(np_conv_same(o6, p["w32"], p["b32"], 1), p["bn32w"], p["bn32b"]))
    o8 = o1 + o3 + o5 + o7
    return gamma * o8 + beta


# ----------------------------------------------------------------------------
if __name__ == "__main__":
    configs = [
        # (B, Cin, Cout, L, Stride)
        (2, 4, 8, 15, 2),      # channel_in=4   -> output_padding = 0, single row tile
        (8, 256, 8, 5, 8),     # channel_in=256 -> output_padding = 5, multi-tile rows
    ]
    key = jax.random.PRNGKey(0)
    for (B, Cin, Cout, L, S) in configs:
        key, kx, kg, kb, kp = jax.random.split(key, 5)
        x = jax.random.normal(kx, (B, Cin, L), jnp.float32)
        gamma = 1.0 + 0.1 * jax.random.normal(kg, (B, Cout, 1), jnp.float32)
        beta = 0.1 * jax.random.normal(kb, (B, Cout, 1), jnp.float32)
        params = init_params(kp, Cin, Cout, S)

        out = upsampling_layer_forward(x, gamma, beta, params, S)
        out = jax.block_until_ready(out)

        ref = ref_forward(np.asarray(x), np.asarray(gamma), np.asarray(beta), params, S)
        np.testing.assert_allclose(np.asarray(out), ref, rtol=1e-3, atol=1e-3)

    print("KERNEL_OK")
</pallas_src>

<mosaic_0001>
module attributes {stable_mosaic.version = 11 : i64} {
  func.func @upsample_kernel(%arg0: i32, %arg1: memref<32x8xf32, #tpu.memory_space<vmem>>, %arg2: memref<8x256xf32, #tpu.memory_space<vmem>>, %arg3: memref<1x256xf32, #tpu.memory_space<vmem>>, %arg4: memref<32x256xf32, #tpu.memory_space<vmem>>) attributes {dimension_semantics = [#tpu.dimension_semantics<parallel>], iteration_bounds = array<i64: 1>, scalar_prefetch = 0 : i64, scratch_operands = 0 : i64, tpu.core_type = #tpu.core_type<tc>, window_params = [{transform_indices = @transform_0, window_bounds = array<i64: 32, 8>}, {pipeline_mode = #tpu.pipeline_mode<synchronous>, transform_indices = @transform_1, window_bounds = array<i64: 8, 256>}, {pipeline_mode = #tpu.pipeline_mode<synchronous>, transform_indices = @transform_2, window_bounds = array<i64: 1, 256>}, {transform_indices = @transform_3, window_bounds = array<i64: 32, 256>}]} {
    %c0 = arith.constant 0 : index
    %c0_0 = arith.constant 0 : index
    %0 = vector.load %arg1[%c0, %c0_0] : memref<32x8xf32, #tpu.memory_space<vmem>>, vector<32x8xf32>
    %c0_1 = arith.constant 0 : index
    %c0_2 = arith.constant 0 : index
    %1 = vector.load %arg2[%c0_1, %c0_2] : memref<8x256xf32, #tpu.memory_space<vmem>>, vector<8x256xf32>
    %cst = arith.constant dense<0.000000e+00> : vector<32x256xf32>
    %2 = tpu.matmul %0, %1, %cst {dimension_numbers = #tpu.dot_dimension_numbers<[1], [0], [0], [1], [0, 0, 1, 1], [], []>} : vector<32x8xf32>, vector<8x256xf32>, vector<32x256xf32> -> vector<32x256xf32>
    %c0_3 = arith.constant 0 : index
    %c0_4 = arith.constant 0 : index
    %3 = vector.load %arg3[%c0_3, %c0_4] : memref<1x256xf32, #tpu.memory_space<vmem>>, vector<1x256xf32>
    %4 = vector.broadcast %3 : vector<1x256xf32> to vector<32x256xf32>
    %5 = arith.addf %2, %4 : vector<32x256xf32>
    %c0_5 = arith.constant 0 : index
    %c0_6 = arith.constant 0 : index
    %6 = vector.load %arg4[%c0_5, %c0_6] : memref<32x256xf32, #tpu.memory_space<vmem>>, vector<32x256xf32>
    tpu.vector_store %arg4[%c0_5, %c0_6], %5 {strides = array<i32>} : memref<32x256xf32, #tpu.memory_space<vmem>>, vector<32x256xf32>,
    return
  }
  func.func @transform_0(%arg0: i32) -> (i32, i32) {
    %c0_i32 = arith.constant 0 : i32
    %c0_i32_0 = arith.constant 0 : i32
    return %arg0, %c0_i32 : i32, i32
  }
  func.func @transform_1(%arg0: i32) -> (i32, i32) {
    %c0_i32 = arith.constant 0 : i32
    %c0_i32_0 = arith.constant 0 : i32
    %c0_i32_1 = arith.constant 0 : i32
    return %c0_i32, %c0_i32_0 : i32, i32
  }
  func.func @transform_2(%arg0: i32) -> (i32, i32) {
    %c0_i32 = arith.constant 0 : i32
    %c0_i32_0 = arith.constant 0 : i32
    %c0_i32_1 = arith.constant 0 : i32
    return %c0_i32, %c0_i32_0 : i32, i32
  }
  func.func @transform_3(%arg0: i32) -> (i32, i32) {
    %c0_i32 = arith.constant 0 : i32
    %c0_i32_0 = arith.constant 0 : i32
    return %arg0, %c0_i32 : i32, i32
  }
}

</mosaic_0001>

<bundles_post_ra>
// kernel: tpu_custom_call.1
= control target key start
LH: loop header
LB: loop body
LE: loop exit
PB: predicated region body
PF: predicated region fallthrough
CT: control target
= control target key end

     0   :  { %vm33_vm0 = vcmask 64512   ;;  %s239_s0 = inlined_call_operand.vmem [shape: f32[32,8], index: 0, kind: input, shape index: {}]   ;;  %s240_s1 = inlined_call_operand.vmem [shape: f32[8,256], index: 1, kind: input, shape index: {}]   ;;  %s241_s2 = inlined_call_operand.vmem [shape: f32[1,256], index: 2, kind: input, shape index: {}]   ;;  %s242_s3 = inlined_call_operand.hbm [shape: f32[32,256], index: 3, kind: output, shape index: {}]  }
   0x1   :  { %v20_v0 = vld [vmem:[%s240_s1 + $0x8] sm:$0xff]  ;;  %v19_v1 = vld [vmem:[%s240_s1] sm:$0xff]  ;;  %v17_v3 = vld [vmem:[%s239_s0 + $0x10] sm:$0xff] }
   0x2   :  { %76 = vmatprep.subr.mxu0 %v20_v0  ;;  %163 = vmatprep.subr.mxu1 %v20_v0  ;;  %v15_v2 = vld [vmem:[%s239_s0] sm:$0xff] }
   0x3   :  { %77 = vmatpush1.msra.mxu0 %v19_v1  ;;  %164 = vmatpush1.msra.mxu1 %v19_v1 }
   0x4   :  { %8 = vsyncpa [#allocation3], 0  ;;  %v191_v4 = vmov 0.0   ;;  %v16_v5 = vld [vmem:[%s239_s0 + $0x8] sm:$0xff]  ;;  %v18_v6 = vld [vmem:[%s239_s0 + $0x18] sm:$0xff]  ;;  %v23_v7 = vlaneseq  ;;  %s192_s0 = smov [#allocation2]  }
   0x5   :  { %110 = vmatprep.mubr.f32.mxu0 %v191_v4  ;;  %122 = vmatprep.mubr.f32.mxu1 %v191_v4  ;;  %v21_v10 = vld [vmem:[%s241_s2] sm:$0x3]  ;;  %s148_s25 = sshll.u32 %s192_s0, 4  ;;  %s149_s25 = int_to_ptr.vmem [resolvable:$true] %s148_s25 }
   0x6   :  { %159 = vmatmul.mubr.msk.f32.vlgmr.msra.gmra.mxu0 %vm33_vm0, %v15_v2  ;;  %161 = vmatmul.mubr.msk.f32.vlgmr.msra.gmra.mxu1 %vm33_vm0, %v17_v3  ;;  %v24_v8 = vshrl.u32 %v23_v7, 7  ;;  %s169_s2 = scalar_lea.vmem %s149_s25, 1024  ;;  %p174_p1 = scmp.lt.s32.totalorder %s149_s25, %s149_s25 }
   0x7   :  { %116 = vmatprep.mubr.f32.mxu0 %v191_v4  ;;  %128 = vmatprep.mubr.f32.mxu1 %v191_v4  ;;  %p170_p0 = scmp.ne.s32.totalorder %s149_s25, %s169_s2  ;;  %p175_p2 = scmp.lt.s32.totalorder %s169_s2, %s169_s2 }
   0x8   :  { %v25_v9 = vsub.s32 0, %v24_v8  ;;  %v29_v11 = vsub.s32 1, %v24_v8 }
   0x9   :  { %p176_p3 = por %p175_p2, %p174_p1 }
   0xa   :  { %160 = vmatmul.mubr.msk.f32.gmra.mxu0 %vm33_vm0, %v16_v5  ;;  %162 = vmatmul.mubr.msk.f32.gmra.mxu1 %vm33_vm0, %v18_v6  ;;  %v26_v12 = vrot.slane %v21_v10, %v25_v9  ;;  %v30_v13 = vrot.slane %v21_v10, %v29_v11 }
   0xb   :  { %p177_p4 = pnand %p176_p3, %p170_p0 }
  0xc6   :  { %v112_v14 = vpop.f32.mrf.mxu0  ;;  %v124_v15 = vpop.f32.mrf.mxu1 }
  0xc7   :  { %v113_v16 = vadd.f32 %v112_v14, %v26_v12  ;;  %v125_v17 = vadd.f32 %v124_v15, %v26_v12 }
  0xc8   :  { %v114_v18 = vpop.f32.mrf.mxu0  ;;  %v126_v19 = vpop.f32.mrf.mxu1 }
  0xc9   :  { %135 = vst [vmem:[#allocation2] sm:$0xff] %v113_v16  ;;  %139 = vst [vmem:[#allocation2 + $0x20] sm:$0xff] %v125_v17  ;;  %v115_v20 = vadd.f32 %v114_v18, %v30_v13  ;;  %v127_v21 = vadd.f32 %v126_v19, %v30_v13 }
  0xca   :  { %v118_v22 = vpop.f32.mrf.mxu0  ;;  %v130_v23 = vpop.f32.mrf.mxu1 }
  0xcb   :  { %136 = vst [vmem:[#allocation2 + $0x8] sm:$0xff] %v115_v20  ;;  %140 = vst [vmem:[#allocation2 + $0x28] sm:$0xff] %v127_v21  ;;  %v119_v24 = vadd.f32 %v118_v22, %v26_v12  ;;  %v131_v25 = vadd.f32 %v130_v23, %v26_v12 }
  0xcc   :  { %v120_v26 = vpop.f32.mrf.mxu0  ;;  %v132_v27 = vpop.f32.mrf.mxu1 }
  0xcd   :  { %137 = vst [vmem:[#allocation2 + $0x10] sm:$0xff] %v119_v24  ;;  %141 = vst [vmem:[#allocation2 + $0x30] sm:$0xff] %v131_v25  ;;  %v121_v28 = vadd.f32 %v120_v26, %v30_v13  ;;  %v133_v29 = vadd.f32 %v132_v27, %v30_v13 }
  0xcf   :  { %138 = vst [vmem:[#allocation2 + $0x18] sm:$0xff] %v121_v28  ;;  %142 = vst [vmem:[#allocation2 + $0x38] sm:$0xff] %v133_v29 }
  0xd0   :  { %180 = shalt.err (!%p177_p4)
}
  0xd1   :  { %s193_s26 = smov 256   ;;  %s194_s27 = smov 16  }
  0xd2   :  { %154 = dma.vmem_to_hbm [thread:$0]  %s149_s25, 1024, %s242_s3, [#allocation3], %s193_s26, %s193_s26, %s194_s27  }
  0xd3   :  { %189 = dma.done.wait [#allocation3], 1024  }
  0xd4   :  { %190 = vsyncadd [#allocation3], 4294966272 }
  0xd5   :  { %158 = vsyncpa [#allocation3], 1 }

</bundles_post_ra>
